<compile_context>
chip_gen: v7x
topology: tpu7x:2x2x1
jax: 0.10.0
libtpu: 0.0.40
codegen_flags: <defaults>
</compile_context>

<pallas_src>
import math
import functools

import jax
import jax.numpy as jnp
from jax.experimental import pallas as pl
from jax.experimental.pallas import tpu as pltpu


def _round_up(n, m):
    return ((n + m - 1) // m) * m


def _largest_dividing_tile(B, cap):
    """Largest multiple of 128 that divides B and is <= cap (None if none)."""
    best = None
    t = 128
    while t <= cap and t <= B:
        if B % t == 0:
            best = t
        t += 128
    return best


def _disc_kernel(x_ref, w1_ref, b1_ref, w2_ref, b2_ref, o_ref):
    # x_ref : (TB, L)   activation tile for this grid step (pipelined)
    # w1_ref: (L, Hp)   resident across grid steps (same block every step)
    # b1_ref: (1, Hp)   resident
    # w2_ref: (1, Hp)   second-layer weights as one lane-dense row, resident
    # b2_ref: (1, 1)    scalar bias in SMEM
    # o_ref : (1, TB)   lane-dense output row for this tile
    x = x_ref[...]
    w1 = w1_ref[...]

    # Layer 1: MXU matmul with f32 accumulation; bias + ReLU on the VPU (f32).
    h = jnp.dot(x, w1, preferred_element_type=jnp.float32)       # (TB, Hp) f32
    h = jnp.maximum(h + b1_ref[...], 0.0)

    # Layer 2 (single output column): VPU multiply + lane reduce instead of an
    # N=1 MXU matmul.  Padded hidden lanes have b1 == 0 and w2 == 0 so they
    # contribute exactly 0.
    z = jnp.sum(h * w2_ref[...], axis=-1, keepdims=True)         # (TB, 1)

    # Transpose (XLU) to a lane-dense (1, TB) row FIRST, then do the bias add
    # and sigmoid with all 128 lanes live (shrinks VPU/EUP pushes ~128x).
    zt = z.T                                                      # (1, TB)
    o_ref[...] = jax.nn.sigmoid(zt + b2_ref[0, 0]).astype(o_ref.dtype)


@functools.partial(jax.jit, static_argnames=("block_b",))
def discriminator_forward(x, w1, b1, w2, b2, *, block_b=8192):
    """sigmoid(relu(x @ w1 + b1) @ w2 + b2) -> (B, 1) f32.

    x : (B, latent), f32 or bf16 (pass bf16 to halve x HBM traffic; the kernel
        accumulates in f32 either way, on v5e/v6e/v7x alike).
    w1: (latent, hidden) stored [in, out]; b1: (1, hidden); w2: (hidden, 1);
    b2: (1, 1).
    """
    B, L = x.shape
    H = w1.shape[1]
    Hp = _round_up(H, 128)                       # lane-dense hidden dim
    block_b = max(128, _round_up(block_b, 128))

    # ---- Batch tiling: avoid any wrapper-side copy of x when possible. ----
    if B <= 256:
        # Tiny batch: one tile whose block == full array (no 8/128 constraint).
        TB, Bp, n_tiles = B, B, 1
        x_in = x
    else:
        # Prefer >= 2 tiles (so v7x megacore can shard) and a tile size that
        # divides B exactly (so x needs no pad/copy before the kernel).
        cap = min(block_b, B // 2)
        TB = _largest_dividing_tile(B, cap)
        if TB is not None:
            Bp, n_tiles = B, B // TB
            x_in = x
        else:
            # Ragged batch: pad only the tail tile (one extra pass over x).
            # TODO(synk): replace with a tiny second pallas_call for the
            # remainder rows to avoid this copy entirely.
            TB = min(block_b, _round_up(B, 128))
            Bp = _round_up(B, TB)
            n_tiles = Bp // TB
            x_in = jnp.pad(x, ((0, Bp - B), (0, 0)))

    # Small, resident operands.  w1 follows x's dtype (bf16 x -> bf16 MXU
    # inputs, f32 accumulation); b1 / w2 / b2 stay f32 for the VPU/EUP path.
    w1_p = jnp.pad(w1.astype(x.dtype), ((0, 0), (0, Hp - H)))
    b1_p = jnp.pad(b1.reshape(1, H).astype(jnp.float32), ((0, 0), (0, Hp - H)))
    w2_row = jnp.pad(w2.reshape(H, 1).T.astype(jnp.float32),
                     ((0, 0), (0, Hp - H)))                       # (1, Hp)
    b2_s = jnp.asarray(b2, jnp.float32).reshape(1, 1)

    # VMEM budget: double-buffered x tile + (TB, Hp) f32 intermediate +
    # resident weights + double-buffered (1, TB) output row.  Explicit limit
    # because v5e's scoped default is only 16 MiB; cap well under v7x's 64 MiB.
    itemsize = x.dtype.itemsize
    vmem_need = (2 * TB * L * itemsize + TB * Hp * 4
                 + L * Hp * itemsize + 3 * Hp * 4 + 2 * TB * 4)
    vmem_limit = int(min(max(2 * vmem_need, 32 << 20), 48 << 20))

    cost = pl.CostEstimate(
        flops=2 * Bp * L * Hp + 2 * Bp * Hp,
        transcendentals=Bp,
        bytes_accessed=Bp * L * itemsize + L * Hp * itemsize
                       + 4 * Hp * 4 + Bp * 4)

    out = pl.pallas_call(
        _disc_kernel,
        out_shape=jax.ShapeDtypeStruct((1, Bp), jnp.float32),
        grid=(n_tiles,),
        in_specs=[
            pl.BlockSpec((TB, L), lambda i: (i, 0)),    # batch tile, pipelined
            pl.BlockSpec((L, Hp), lambda i: (0, 0)),    # resident weights
            pl.BlockSpec((1, Hp), lambda i: (0, 0)),    # resident bias
            pl.BlockSpec((1, Hp), lambda i: (0, 0)),    # resident w2 row
            pl.BlockSpec(memory_space=pltpu.MemorySpace.SMEM),  # b2 scalar
        ],
        out_specs=pl.BlockSpec((1, TB), lambda i: (0, i)),        # lane-dense
        compiler_params=pltpu.CompilerParams(
            dimension_semantics=("parallel",),        # megacore sharding (v7x)
            vmem_limit_bytes=vmem_limit),
        cost_estimate=cost,
    )(x_in, w1_p, b1_p, w2_row, b2_s)

    return out.reshape(Bp)[:B].reshape(B, 1)


def xavier_uniform(key, fan_in, fan_out, dtype=jnp.float32):
    # Matches torch.nn.init.xavier_uniform_ (gain=1).
    bound = math.sqrt(6.0 / (fan_in + fan_out))
    return jax.random.uniform(key, (fan_in, fan_out), dtype=dtype,
                              minval=-bound, maxval=bound)


def make_discriminator_params(key, latent_size, data_size):
    hidden = math.ceil(math.sqrt(data_size))
    k1, k2 = jax.random.split(key)
    w1 = xavier_uniform(k1, latent_size, hidden)           # stored [in, out]
    b1 = jnp.full((1, hidden), 0.01, dtype=jnp.float32)    # bias filled 0.01
    w2 = xavier_uniform(k2, hidden, 1)
    b2 = jnp.full((1, 1), 0.01, dtype=jnp.float32)
    return w1, b1, w2, b2


def _reference(x, w1, b1, w2, b2):
    xf = x.astype(jnp.float32)
    return jax.nn.sigmoid(jnp.maximum(xf @ w1 + b1, 0.0) @ w2 + b2)


# TODO(synk): save()/load() checkpointing from the PyTorch module is host-side
# file I/O and has no Pallas equivalent; only forward() is implemented.

if __name__ == "__main__":
    latent_size = 32
    data_size = 256            # hidden = ceil(sqrt(256)) = 16

    key = jax.random.PRNGKey(0)
    kx, kp, kx2, kx3 = jax.random.split(key, 4)
    w1, b1, w2, b2 = make_discriminator_params(kp, latent_size, data_size)

    # Small single-tile check (block == full array, no padding).
    x = jax.random.normal(kx, (8, latent_size), dtype=jnp.float32)
    out = jax.block_until_ready(discriminator_forward(x, w1, b1, w2, b2))
    ref = _reference(x, w1, b1, w2, b2)
    assert out.shape == (8, 1)
    assert jnp.allclose(out, ref, atol=1e-5, rtol=1e-5)

    # Multi-tile, divisible batch: no wrapper-side copy of x at all.
    x2 = jax.random.normal(kx2, (1024, latent_size), dtype=jnp.float32)
    out2 = jax.block_until_ready(
        discriminator_forward(x2, w1, b1, w2, b2, block_b=256))
    ref2 = _reference(x2, w1, b1, w2, b2)
    assert out2.shape == (1024, 1)
    assert jnp.allclose(out2, ref2, atol=1e-5, rtol=1e-5)

    # Ragged batch: exercises the padded-tail fallback path.
    x3 = jax.random.normal(kx3, (1000, latent_size), dtype=jnp.float32)
    out3 = jax.block_until_ready(
        discriminator_forward(x3, w1, b1, w2, b2, block_b=256))
    ref3 = _reference(x3, w1, b1, w2, b2)
    assert out3.shape == (1000, 1)
    assert jnp.allclose(out3, ref3, atol=1e-5, rtol=1e-5)

    # bf16 activations (caller-supplied): halves x HBM traffic, f32 accumulate.
    out_bf = jax.block_until_ready(
        discriminator_forward(x2.astype(jnp.bfloat16), w1, b1, w2, b2,
                              block_b=256))
    assert jnp.allclose(out_bf, ref2, atol=5e-2, rtol=5e-2)

    print("KERNEL_OK")
</pallas_src>

<mosaic_0001>
module attributes {stable_mosaic.version = 11 : i64} {
  func.func @_disc_kernel(%arg0: i32, %arg1: memref<8x32xf32, #tpu.memory_space<vmem>>, %arg2: memref<32x128xf32, #tpu.memory_space<vmem>>, %arg3: memref<1x128xf32, #tpu.memory_space<vmem>>, %arg4: memref<1x128xf32, #tpu.memory_space<vmem>>, %arg5: memref<1x1xf32, #tpu.memory_space<smem>>, %arg6: memref<1x8xf32, #tpu.memory_space<vmem>>) attributes {dimension_semantics = [#tpu.dimension_semantics<parallel>], iteration_bounds = array<i64: 1>, scalar_prefetch = 0 : i64, scratch_operands = 0 : i64, tpu.core_type = #tpu.core_type<tc>, window_params = [{transform_indices = @transform_0, window_bounds = array<i64: 8, 32>}, {pipeline_mode = #tpu.pipeline_mode<synchronous>, transform_indices = @transform_1, window_bounds = array<i64: 32, 128>}, {pipeline_mode = #tpu.pipeline_mode<synchronous>, transform_indices = @transform_2, window_bounds = array<i64: 1, 128>}, {pipeline_mode = #tpu.pipeline_mode<synchronous>, transform_indices = @transform_3, window_bounds = array<i64: 1, 128>}, {transform_indices = @transform_4, window_bounds = array<i64: 1, 1>}, {transform_indices = @transform_5, window_bounds = array<i64: 1, 8>}]} {
    %c0 = arith.constant 0 : index
    %c0_0 = arith.constant 0 : index
    %0 = vector.load %arg1[%c0, %c0_0] : memref<8x32xf32, #tpu.memory_space<vmem>>, vector<8x32xf32>
    %c0_1 = arith.constant 0 : index
    %c0_2 = arith.constant 0 : index
    %1 = vector.load %arg2[%c0_1, %c0_2] : memref<32x128xf32, #tpu.memory_space<vmem>>, vector<32x128xf32>
    %cst = arith.constant dense<0.000000e+00> : vector<8x128xf32>
    %2 = tpu.matmul %0, %1, %cst {dimension_numbers = #tpu.dot_dimension_numbers<[1], [0], [0], [1], [0, 0, 1, 1], [], []>} : vector<8x32xf32>, vector<32x128xf32>, vector<8x128xf32> -> vector<8x128xf32>
    %c0_3 = arith.constant 0 : index
    %c0_4 = arith.constant 0 : index
    %3 = vector.load %arg3[%c0_3, %c0_4] : memref<1x128xf32, #tpu.memory_space<vmem>>, vector<1x128xf32>
    %4 = vector.broadcast %3 : vector<1x128xf32> to vector<8x128xf32>
    %5 = arith.addf %2, %4 : vector<8x128xf32>
    %cst_5 = arith.constant 0.000000e+00 : f32
    %6 = vector.broadcast %cst_5 : f32 to vector<8x128xf32>
    %7 = arith.maximumf %5, %6 : vector<8x128xf32>
    %c0_6 = arith.constant 0 : index
    %c0_7 = arith.constant 0 : index
    %8 = vector.load %arg4[%c0_6, %c0_7] : memref<1x128xf32, #tpu.memory_space<vmem>>, vector<1x128xf32>
    %9 = vector.broadcast %8 : vector<1x128xf32> to vector<8x128xf32>
    %10 = arith.mulf %7, %9 : vector<8x128xf32>
    %cst_8 = arith.constant dense<0.000000e+00> : vector<8xf32>
    %11 = vector.multi_reduction <add>, %10, %cst_8 [1] : vector<8x128xf32> to vector<8xf32>
    %12 = vector.shape_cast %11 : vector<8xf32> to vector<8x1xf32>
    %13 = tpu.transpose %12, [1, 0] : vector<8x1xf32> -> vector<1x8xf32>
    %c0_9 = arith.constant 0 : index
    %c0_10 = arith.constant 0 : index
    %14 = memref.load %arg5[%c0_9, %c0_10] : memref<1x1xf32, #tpu.memory_space<smem>>
    %15 = vector.broadcast %14 : f32 to vector<1x8xf32>
    %16 = arith.addf %13, %15 : vector<1x8xf32>
    %17 = arith.negf %16 : vector<1x8xf32>
    %18 = math.exp %17 : vector<1x8xf32>
    %cst_11 = arith.constant 1.000000e+00 : f32
    %19 = vector.broadcast %cst_11 : f32 to vector<1x8xf32>
    %20 = arith.addf %19, %18 : vector<1x8xf32>
    %21 = arith.divf %19, %20 : vector<1x8xf32>
    %c0_12 = arith.constant 0 : index
    %c0_13 = arith.constant 0 : index
    %22 = vector.load %arg6[%c0_12, %c0_13] : memref<1x8xf32, #tpu.memory_space<vmem>>, vector<1x8xf32>
    tpu.vector_store %arg6[%c0_12, %c0_13], %21 {strides = array<i32>} : memref<1x8xf32, #tpu.memory_space<vmem>>, vector<1x8xf32>,
    return
  }
  func.func @transform_0(%arg0: i32) -> (i32, i32) {
    %c0_i32 = arith.constant 0 : i32
    %c0_i32_0 = arith.constant 0 : i32
    return %arg0, %c0_i32 : i32, i32
  }
  func.func @transform_1(%arg0: i32) -> (i32, i32) {
    %c0_i32 = arith.constant 0 : i32
    %c0_i32_0 = arith.constant 0 : i32
    %c0_i32_1 = arith.constant 0 : i32
    return %c0_i32, %c0_i32_0 : i32, i32
  }
  func.func @transform_2(%arg0: i32) -> (i32, i32) {
    %c0_i32 = arith.constant 0 : i32
    %c0_i32_0 = arith.constant 0 : i32
    %c0_i32_1 = arith.constant 0 : i32
    return %c0_i32, %c0_i32_0 : i32, i32
  }
  func.func @transform_3(%arg0: i32) -> (i32, i32) {
    %c0_i32 = arith.constant 0 : i32
    %c0_i32_0 = arith.constant 0 : i32
    %c0_i32_1 = arith.constant 0 : i32
    return %c0_i32, %c0_i32_0 : i32, i32
  }
  func.func @transform_4(%arg0: i32) -> (i32, i32) {
    %c0_i32 = arith.constant 0 : i32
    %c0_i32_0 = arith.constant 0 : i32
    %c0_i32_1 = arith.constant 0 : i32
    return %c0_i32, %c0_i32_0 : i32, i32
  }
  func.func @transform_5(%arg0: i32) -> (i32, i32) {
    %c0_i32 = arith.constant 0 : i32
    %c0_i32_0 = arith.constant 0 : i32
    return %c0_i32, %arg0 : i32, i32
  }
}

</mosaic_0001>

<bundles_post_ra>
// kernel: discriminator_forward.1
= control target key start
LH: loop header
LB: loop body
LE: loop exit
PB: predicated region body
PF: predicated region fallthrough
CT: control target
= control target key end

     0   :  { %v234_v3 = vmov 0.0|0.0   ;;  %vm235_vm0 = vmmov 0   ;;  %v236_v6 = vmov 0.0   ;;  %s304_s0 = inlined_call_operand.vmem [shape: f32[8,32], index: 0, kind: input, shape index: {}]   ;;  %s305_s1 = inlined_call_operand.vmem [shape: f32[32,128], index: 1, kind: input, shape index: {}]   ;;  %s306_s2 = inlined_call_operand.vmem [shape: f32[1,128], index: 2, kind: input, shape index: {}]   ;;  %s307_s3 = inlined_call_operand.vmem [shape: f32[1,128], index: 3, kind: input, shape index: {}]   ;;  %s308_s4 = inlined_call_operand.<no memory space> [shape: f32[1,1], index: 4, kind: input, shape index: {}]   ;;  %s309_s5 = inlined_call_operand.hbm [shape: f32[1,8], index: 5, kind: output, shape index: {}]  }
   0x1   :  { %v23_v0 = vld [vmem:[%s305_s1] sm:$0xff]  ;;  %v24_v1 = vld [vmem:[%s305_s1 + $0x8] sm:$0xff]  ;;  %v25_v2 = vld [vmem:[%s305_s1 + $0x10] sm:$0xff]  ;;  %196 = vmatprep.subr.bf16.mxu0 %v234_v3  ;;  %193 = vmatprep.mubr.msk.f32.mxu0 %vm235_vm0, %v236_v6 }
   0x2   :  { %v197_v4 = vpack.c.bf16 %v24_v1, %v23_v0  ;;  %v26_v5 = vld [vmem:[%s305_s1 + $0x18] sm:$0xff] }
   0x3   :  { %11 = vsyncpa [#allocation4], 0  ;;  %v200_v7 = vpack.c.bf16 %v26_v5, %v25_v2  ;;  %v22_v8 = vld [vmem:[%s304_s0] sm:$0xff]  ;;  %vm34_vm1 = vcmask 261120   ;;  %v152_v17 = vstv %s308_s4  ;;  %vm160_vm2 = vcmask 57344  }
   0x4   :  { %198 = vmatpush3.bf16.msra.mxu0 %v197_v4  ;;  %v176_v9 = vld [vmem:[%s306_s2] ss:$0 sm:$0xff]  ;;  %s237_s2 = smov [#allocation3]  }
   0x5   :  { %199 = vmatprep.subr.bf16.mxu0 %v234_v3  ;;  %v178_v13 = vld [vmem:[%s307_s3] ss:$0 sm:$0xff]  ;;  %s168_s7 = sshll.u32 %s237_s2, 4  ;;  %s169_s7 = int_to_ptr.vmem [resolvable:$true] %s168_s7 }
   0x6   :  { %s210_s3 = scalar_lea.vmem %s169_s7, 16  ;;  %s214_s8 = scalar_lea.vmem %s169_s7, 32 }
   0x7   :  { %p211_p0 = scmp.ne.s32.totalorder %s169_s7, %s210_s3  ;;  %p215_p1 = scmp.lt.s32.totalorder %s169_s7, %s169_s7 }
   0x8   :  { %201 = vmatpush3.bf16.msra.mxu0 %v200_v7  ;;  %p216_p2 = scmp.lt.s32.totalorder %s214_s8, %s210_s3 }
   0xa   :  { %p217_p3 = por %p216_p2, %p215_p1 }
   0xb   :  { %194 = vmatmul.mubr.msk.f32.vlgmr.msra.gmra.mrb[0].mxu0 %vm34_vm1, %v22_v8 }
   0xc   :  { %p218_p4 = pnand %p217_p3, %p211_p0 }
  0xde   :  { %v104_v10 = vpop.f32.mrb[0].mxu0 }
  0xdf   :  { %v105_v11 = vadd.f32 %v176_v9, %v104_v10  ;;  %v195_v12 = vpop.f32.mrb[1].mxu0 }
  0xe1   :  { %v108_v14 = vmax.f32 %v105_v11, 0.0 }
  0xe3   :  { %v116_v15 = vmul.f32 %v178_v13, %v108_v14 }
  0xe5   :  { %117 = vadd.xlane.f32.xlu0 %v116_v15 }
 0x172   :  { %v118_v16 = vpop.xlane.xlu0 %117 }
 0x173   :  { %119 = vxpose.xlu0.b32.start.end [1/1] (short) (narrow) %v118_v16, 8 }
 0x1f3   :  { %v135_v18 = vpop.trf.xlu0 }
 0x1f4   :  { %v153_v19 = vadd.f32 %v152_v17, %v135_v18 }
 0x1f6   :  { %v179_v20 = vmul.f32 -1.442695, %v153_v19 }
 0x1f8   :  { %206 = vpow2.f32 %v179_v20 }
 0x202   :  { %v207_v21 = vpop.eup %206 }
 0x203   :  { %v157_v22 = vadd.f32 1.0, %v207_v21 }
 0x205   :  { %208 = vrcp.f32 %v157_v22 }
 0x20f   :  { %v209_v23 = vpop.eup %208 }
 0x210   :  { %161 = vst.msk [vmem:[#allocation3] sm:$0x1] %vm160_vm2, %v209_v23 }
 0x211   :  { %221 = shalt.err (!%p218_p4)
}
 0x212   :  { %s222_s10 = scalar_lea.hbm %s309_s5, 16 }
 0x213   :  { %p223_p5 = scmp.ne.s32.totalorder %s309_s5, %s222_s10  ;;  %p226_p6 = scmp.lt.u32.totalorder %s222_s10, %s309_s5 }
 0x215   :  { %p228_p7 = pnand %p226_p6, %p223_p5 }
 0x217   :  { %231 = shalt.err (!%p228_p7)
}
 0x218   :  { %171 = dma.vmem_to_hbm [thread:$0]  %s169_s7, 16, %s309_s5, [#allocation4]  }
 0x219   :  { %232 = dma.done.wait [#allocation4], 16  }
 0x21a   :  { %233 = vsyncadd [#allocation4], 4294967280 }
 0x21b   :  { %175 = vsyncpa [#allocation4], 1 }

</bundles_post_ra>
